<compile_context>
chip_gen: v5e
topology: v5e:2x2
jax: 0.10.0
libtpu: 0.0.40
codegen_flags: <defaults>
</compile_context>

<pallas_src>
import functools

import jax
import jax.numpy as jnp
from jax.experimental import pallas as pl
from jax.experimental.pallas import tpu as pltpu

H1, H2, OUT = 128, 64, 10
H2_PAD = 128   # hidden layer zero-padded to a full lane group
OUT_PAD = 128  # lane-dense output width (>= OUT, multiple of 128)


def _round_up(x, m):
    return ((x + m - 1) // m) * m


def _choose_tile_b(B):
    # Aim for ~8 grid steps when B is large (pipelining + v7x dual-TC work),
    # round the tile to a multiple of 128 so the MXU M-dim and all stores are
    # unmasked, and cap at 1024 rows to keep the per-step footprint a few MiB.
    tile = _round_up(max(1, pl.cdiv(B, 8)), 128)
    return max(128, min(1024, tile))


def mlp_kernel(x_ref, w1_ref, b1_ref, w2_ref, b2_ref, w3_ref, b3_ref, o_ref):
    # fc1 + relu: x arrives f32 (single HBM pass), cast to bf16 for the MXU.
    x = x_ref[...].astype(jnp.bfloat16)
    h1 = jnp.dot(x, w1_ref[...], preferred_element_type=jnp.float32)
    h1 = jnp.maximum(h1 + b1_ref[...], 0.0)
    # fc2 + relu (N padded to 128; padded columns stay exactly 0 after relu)
    h2 = jnp.dot(h1.astype(jnp.bfloat16), w2_ref[...],
                 preferred_element_type=jnp.float32)
    h2 = jnp.maximum(h2 + b2_ref[...], 0.0)
    # fc3 + relu (K and N padded to 128; padded W3 rows are 0 so no effect)
    h3 = jnp.dot(h2.astype(jnp.bfloat16), w3_ref[...],
                 preferred_element_type=jnp.float32)
    o_ref[...] = jnp.maximum(h3 + b3_ref[...], 0.0).astype(o_ref.dtype)


def prepare_params(params):
    """One-time (outside jit) bf16 cast + zero-padding of the weights."""
    w1 = params["w1"].astype(jnp.bfloat16)                                # (D, 128)
    b1 = params["b1"].reshape(1, H1).astype(jnp.float32)                  # (1, 128)
    w2 = jnp.zeros((H1, H2_PAD), jnp.float32)
    w2 = w2.at[:, :H2].set(params["w2"]).astype(jnp.bfloat16)             # (128, 128)
    b2 = jnp.zeros((1, H2_PAD), jnp.float32)
    b2 = b2.at[:, :H2].set(params["b2"].reshape(1, H2))                   # (1, 128)
    w3 = jnp.zeros((H2_PAD, OUT_PAD), jnp.float32)
    w3 = w3.at[:H2, :OUT].set(params["w3"]).astype(jnp.bfloat16)          # (128, 128)
    b3 = jnp.zeros((1, OUT_PAD), jnp.float32)
    b3 = b3.at[:, :OUT].set(params["b3"].reshape(1, OUT))                 # (1, 128)
    return {"w1": w1, "b1": b1, "w2": w2, "b2": b2, "w3": w3, "b3": b3}


@functools.partial(jax.jit, static_argnames=("tile_b",))
def mnist_net_forward(x, prepped, *, tile_b=None):
    """x: [B, D] float32.  prepped: output of prepare_params().  Returns [B, 10] f32."""
    B, D = x.shape
    if tile_b is None:
        tile_b = _choose_tile_b(B)
    tile_b = max(8, _round_up(int(tile_b), 8))

    grid = (pl.cdiv(B, tile_b),)  # partial last block handled by Pallas

    def batch_map(i):
        return (i, 0)

    def full_map(i):
        return (0, 0)

    out_padded = pl.pallas_call(
        mlp_kernel,
        out_shape=jax.ShapeDtypeStruct((B, OUT_PAD), jnp.bfloat16),
        grid_spec=pltpu.PrefetchScalarGridSpec(
            num_scalar_prefetch=0,
            grid=grid,
            in_specs=[
                pl.BlockSpec((tile_b, D), batch_map),       # x tile (f32, streams)
                pl.BlockSpec((D, H1), full_map),            # W1^T (bf16, resident)
                pl.BlockSpec((1, H1), full_map),            # b1
                pl.BlockSpec((H1, H2_PAD), full_map),       # W2^T (padded)
                pl.BlockSpec((1, H2_PAD), full_map),        # b2   (padded)
                pl.BlockSpec((H2_PAD, OUT_PAD), full_map),  # W3^T (padded)
                pl.BlockSpec((1, OUT_PAD), full_map),       # b3   (padded)
            ],
            out_specs=pl.BlockSpec((tile_b, OUT_PAD), batch_map),
        ),
        compiler_params=pltpu.CompilerParams(
            dimension_semantics=("parallel",),
            # Footprint is a few MiB at tile_b=1024; 48 MiB leaves headroom
            # under v7x's 64 MiB physical VMEM while allowing larger tiles on
            # v5e/v6e (128 MiB physical) if tile_b is raised by the caller.
            vmem_limit_bytes=48 * 1024 * 1024,
        ),
    )(x, prepped["w1"], prepped["b1"], prepped["w2"], prepped["b2"],
      prepped["w3"], prepped["b3"])

    # Single fused slice + upcast back to f32 logits (bf16 stays in HBM).
    return out_padded[:, :OUT].astype(jnp.float32)


def init_params(key, input_dim):
    """Deterministic init matching nn.Linear shapes (stored transposed)."""
    k1, k2, k3, k4, k5, k6 = jax.random.split(key, 6)

    def linear(kw, kb, fan_in, fan_out):
        bound = 1.0 / jnp.sqrt(fan_in)
        w = jax.random.uniform(kw, (fan_in, fan_out), jnp.float32, -bound, bound)
        b = jax.random.uniform(kb, (1, fan_out), jnp.float32, -bound, bound)
        return w, b

    w1, b1 = linear(k1, k2, input_dim, H1)
    w2, b2 = linear(k3, k4, H1, H2)
    w3, b3 = linear(k5, k6, H2, OUT)
    return {"w1": w1, "b1": b1, "w2": w2, "b2": b2, "w3": w3, "b3": b3}


def reference_forward(x, params):
    """Plain-JAX reference using the same bf16-in / f32-accumulate recipe."""
    h = jnp.dot(x.astype(jnp.bfloat16), params["w1"].astype(jnp.bfloat16),
                preferred_element_type=jnp.float32)
    h = jnp.maximum(h + params["b1"], 0.0)
    h = jnp.dot(h.astype(jnp.bfloat16), params["w2"].astype(jnp.bfloat16),
                preferred_element_type=jnp.float32)
    h = jnp.maximum(h + params["b2"], 0.0)
    h = jnp.dot(h.astype(jnp.bfloat16), params["w3"].astype(jnp.bfloat16),
                preferred_element_type=jnp.float32)
    return jnp.maximum(h + params["b3"], 0.0)


if __name__ == "__main__":
    key = jax.random.PRNGKey(0)
    kx, kp, kx2 = jax.random.split(key, 3)

    INPUT_DIM = 256  # flattened MNIST-like input (kept small)
    params = init_params(kp, INPUT_DIM)
    prepped = prepare_params(params)  # one-time cast/pad, outside jit

    # Multi-step grid: B=512 with tile_b=128 -> 4 pipelined / parallel steps.
    B = 512
    x = jax.random.normal(kx, (B, INPUT_DIM), dtype=jnp.float32)
    out = jax.block_until_ready(mnist_net_forward(x, prepped, tile_b=128))
    ref = reference_forward(x, params)
    assert out.shape == (B, OUT)
    assert jnp.allclose(out, ref, atol=2e-2, rtol=2e-2), (
        float(jnp.max(jnp.abs(out - ref))))

    # Ragged batch (not a multiple of the tile): exercises the Pallas partial
    # last block (padded reads / dropped OOB writes) with no jnp.pad copy.
    B2 = 37
    x2 = jax.random.normal(kx2, (B2, INPUT_DIM), dtype=jnp.float32)
    out2 = jax.block_until_ready(mnist_net_forward(x2, prepped))
    ref2 = reference_forward(x2, params)
    assert out2.shape == (B2, OUT)
    assert jnp.allclose(out2, ref2, atol=2e-2, rtol=2e-2), (
        float(jnp.max(jnp.abs(out2 - ref2))))

    print("KERNEL_OK")
</pallas_src>

<mosaic_0001>
module attributes {stable_mosaic.version = 11 : i64} {
  func.func @mlp_kernel(%arg0: i32, %arg1: memref<128x256xf32, #tpu.memory_space<vmem>>, %arg2: memref<256x128xbf16, #tpu.memory_space<vmem>>, %arg3: memref<1x128xf32, #tpu.memory_space<vmem>>, %arg4: memref<128x128xbf16, #tpu.memory_space<vmem>>, %arg5: memref<1x128xf32, #tpu.memory_space<vmem>>, %arg6: memref<128x128xbf16, #tpu.memory_space<vmem>>, %arg7: memref<1x128xf32, #tpu.memory_space<vmem>>, %arg8: memref<128x128xbf16, #tpu.memory_space<vmem>>) attributes {dimension_semantics = [#tpu.dimension_semantics<parallel>], iteration_bounds = array<i64: 4>, scalar_prefetch = 0 : i64, scratch_operands = 0 : i64, tpu.core_type = #tpu.core_type<tc>, window_params = [{transform_indices = @transform_0, window_bounds = array<i64: 128, 256>}, {pipeline_mode = #tpu.pipeline_mode<synchronous>, transform_indices = @transform_1, window_bounds = array<i64: 256, 128>}, {pipeline_mode = #tpu.pipeline_mode<synchronous>, transform_indices = @transform_2, window_bounds = array<i64: 1, 128>}, {pipeline_mode = #tpu.pipeline_mode<synchronous>, transform_indices = @transform_3, window_bounds = array<i64: 128, 128>}, {pipeline_mode = #tpu.pipeline_mode<synchronous>, transform_indices = @transform_4, window_bounds = array<i64: 1, 128>}, {pipeline_mode = #tpu.pipeline_mode<synchronous>, transform_indices = @transform_5, window_bounds = array<i64: 128, 128>}, {pipeline_mode = #tpu.pipeline_mode<synchronous>, transform_indices = @transform_6, window_bounds = array<i64: 1, 128>}, {transform_indices = @transform_7, window_bounds = array<i64: 128, 128>}]} {
    %c0 = arith.constant 0 : index
    %c0_0 = arith.constant 0 : index
    %0 = vector.load %arg1[%c0, %c0_0] : memref<128x256xf32, #tpu.memory_space<vmem>>, vector<128x256xf32>
    %1 = arith.truncf %0 : vector<128x256xf32> to vector<128x256xbf16>
    %c0_1 = arith.constant 0 : index
    %c0_2 = arith.constant 0 : index
    %2 = vector.load %arg2[%c0_1, %c0_2] : memref<256x128xbf16, #tpu.memory_space<vmem>>, vector<256x128xbf16>
    %cst = arith.constant dense<0.000000e+00> : vector<128x128xf32>
    %3 = tpu.matmul %1, %2, %cst {dimension_numbers = #tpu.dot_dimension_numbers<[1], [0], [0], [1], [0, 0, 1, 1], [], []>} : vector<128x256xbf16>, vector<256x128xbf16>, vector<128x128xf32> -> vector<128x128xf32>
    %c0_3 = arith.constant 0 : index
    %c0_4 = arith.constant 0 : index
    %4 = vector.load %arg3[%c0_3, %c0_4] : memref<1x128xf32, #tpu.memory_space<vmem>>, vector<1x128xf32>
    %5 = vector.broadcast %4 : vector<1x128xf32> to vector<128x128xf32>
    %6 = arith.addf %3, %5 : vector<128x128xf32>
    %cst_5 = arith.constant 0.000000e+00 : f32
    %7 = vector.broadcast %cst_5 : f32 to vector<128x128xf32>
    %8 = arith.maximumf %6, %7 : vector<128x128xf32>
    %9 = arith.truncf %8 : vector<128x128xf32> to vector<128x128xbf16>
    %c0_6 = arith.constant 0 : index
    %c0_7 = arith.constant 0 : index
    %10 = vector.load %arg4[%c0_6, %c0_7] : memref<128x128xbf16, #tpu.memory_space<vmem>>, vector<128x128xbf16>
    %cst_8 = arith.constant dense<0.000000e+00> : vector<128x128xf32>
    %11 = tpu.matmul %9, %10, %cst_8 {dimension_numbers = #tpu.dot_dimension_numbers<[1], [0], [0], [1], [0, 0, 1, 1], [], []>} : vector<128x128xbf16>, vector<128x128xbf16>, vector<128x128xf32> -> vector<128x128xf32>
    %c0_9 = arith.constant 0 : index
    %c0_10 = arith.constant 0 : index
    %12 = vector.load %arg5[%c0_9, %c0_10] : memref<1x128xf32, #tpu.memory_space<vmem>>, vector<1x128xf32>
    %13 = vector.broadcast %12 : vector<1x128xf32> to vector<128x128xf32>
    %14 = arith.addf %11, %13 : vector<128x128xf32>
    %cst_11 = arith.constant 0.000000e+00 : f32
    %15 = vector.broadcast %cst_11 : f32 to vector<128x128xf32>
    %16 = arith.maximumf %14, %15 : vector<128x128xf32>
    %17 = arith.truncf %16 : vector<128x128xf32> to vector<128x128xbf16>
    %c0_12 = arith.constant 0 : index
    %c0_13 = arith.constant 0 : index
    %18 = vector.load %arg6[%c0_12, %c0_13] : memref<128x128xbf16, #tpu.memory_space<vmem>>, vector<128x128xbf16>
    %cst_14 = arith.constant dense<0.000000e+00> : vector<128x128xf32>
    %19 = tpu.matmul %17, %18, %cst_14 {dimension_numbers = #tpu.dot_dimension_numbers<[1], [0], [0], [1], [0, 0, 1, 1], [], []>} : vector<128x128xbf16>, vector<128x128xbf16>, vector<128x128xf32> -> vector<128x128xf32>
    %c0_15 = arith.constant 0 : index
    %c0_16 = arith.constant 0 : index
    %20 = vector.load %arg7[%c0_15, %c0_16] : memref<1x128xf32, #tpu.memory_space<vmem>>, vector<1x128xf32>
    %21 = vector.broadcast %20 : vector<1x128xf32> to vector<128x128xf32>
    %22 = arith.addf %19, %21 : vector<128x128xf32>
    %cst_17 = arith.constant 0.000000e+00 : f32
    %23 = vector.broadcast %cst_17 : f32 to vector<128x128xf32>
    %24 = arith.maximumf %22, %23 : vector<128x128xf32>
    %25 = arith.truncf %24 : vector<128x128xf32> to vector<128x128xbf16>
    %c0_18 = arith.constant 0 : index
    %c0_19 = arith.constant 0 : index
    %26 = vector.load %arg8[%c0_18, %c0_19] : memref<128x128xbf16, #tpu.memory_space<vmem>>, vector<128x128xbf16>
    tpu.vector_store %arg8[%c0_18, %c0_19], %25 {strides = array<i32>} : memref<128x128xbf16, #tpu.memory_space<vmem>>, vector<128x128xbf16>,
    return
  }
  func.func @transform_0(%arg0: i32) -> (i32, i32) {
    %c0_i32 = arith.constant 0 : i32
    %c0_i32_0 = arith.constant 0 : i32
    return %arg0, %c0_i32 : i32, i32
  }
  func.func @transform_1(%arg0: i32) -> (i32, i32) {
    %c0_i32 = arith.constant 0 : i32
    %c0_i32_0 = arith.constant 0 : i32
    %c0_i32_1 = arith.constant 0 : i32
    return %c0_i32, %c0_i32_0 : i32, i32
  }
  func.func @transform_2(%arg0: i32) -> (i32, i32) {
    %c0_i32 = arith.constant 0 : i32
    %c0_i32_0 = arith.constant 0 : i32
    %c0_i32_1 = arith.constant 0 : i32
    return %c0_i32, %c0_i32_0 : i32, i32
  }
  func.func @transform_3(%arg0: i32) -> (i32, i32) {
    %c0_i32 = arith.constant 0 : i32
    %c0_i32_0 = arith.constant 0 : i32
    %c0_i32_1 = arith.constant 0 : i32
    return %c0_i32, %c0_i32_0 : i32, i32
  }
  func.func @transform_4(%arg0: i32) -> (i32, i32) {
    %c0_i32 = arith.constant 0 : i32
    %c0_i32_0 = arith.constant 0 : i32
    %c0_i32_1 = arith.constant 0 : i32
    return %c0_i32, %c0_i32_0 : i32, i32
  }
  func.func @transform_5(%arg0: i32) -> (i32, i32) {
    %c0_i32 = arith.constant 0 : i32
    %c0_i32_0 = arith.constant 0 : i32
    %c0_i32_1 = arith.constant 0 : i32
    return %c0_i32, %c0_i32_0 : i32, i32
  }
  func.func @transform_6(%arg0: i32) -> (i32, i32) {
    %c0_i32 = arith.constant 0 : i32
    %c0_i32_0 = arith.constant 0 : i32
    %c0_i32_1 = arith.constant 0 : i32
    return %c0_i32, %c0_i32_0 : i32, i32
  }
  func.func @transform_7(%arg0: i32) -> (i32, i32) {
    %c0_i32 = arith.constant 0 : i32
    %c0_i32_0 = arith.constant 0 : i32
    return %arg0, %c0_i32 : i32, i32
  }
}

</mosaic_0001>

<bundles_post_ra>
// kernel: mnist_net_forward.1
= control target key start
LH: loop header
LB: loop body
LE: loop exit
PB: predicated region body
PF: predicated region fallthrough
CT: control target
= control target key end

     0   :  { %12 = vsyncpa [#allocation3], 0  ;;  %s1840_s0 = inlined_call_operand.hbm [shape: f32[512,256], index: 0, kind: input, shape index: {}]   ;;  %s1841_s1 = inlined_call_operand.hbm [shape: bf16[256,128], index: 1, kind: input, shape index: {}]   ;;  %s1842_s2 = inlined_call_operand.hbm [shape: f32[1,128], index: 2, kind: input, shape index: {}]   ;;  %s1843_s3 = inlined_call_operand.hbm [shape: bf16[128,128], index: 3, kind: input, shape index: {}]   ;;  %s1844_s4 = inlined_call_operand.vmem [shape: f32[1,128], index: 4, kind: input, shape index: {}]   ;;  %s1845_s5 = inlined_call_operand.hbm [shape: bf16[128,128], index: 5, kind: input, shape index: {}]   ;;  %s1846_s6 = inlined_call_operand.vmem [shape: f32[1,128], index: 6, kind: input, shape index: {}]   ;;  %s1847_s7 = inlined_call_operand.vmem [shape: bf16[512,128], index: 7, kind: output, shape index: {}]  }
   0x1   :  { %14 = vsyncpa [#allocation3 + $0x1], 0 }
   0x2   :  { %15 = vsyncpa [#allocation5], 0 }
   0x3   :  { %16 = vsyncpa [#allocation8], 0  ;;  %s1641_s24 = smov 0   ;;  %s1643_s25 = smov 0  }
   0x4   :  { %s1645_s26 = smov 0   ;;  %s1647_s27 = smov 0  }
   0x5 LB: > { %s1848_s28 = sadd.s32 4294967295, %s1591_s27   ;;  %p42_p0 = scmp.ne.s32.totalorder %s1583_s25, %s1579_s24  ;;  %s1591_s27 = sphi %s1647_s27, %s1858_s27   ;;  %s1587_s26 = sphi %s1645_s26, %s1857_s26   ;;  %s1583_s25 = sphi %s1643_s25, %s1856_s25   ;;  %s1579_s24 = sphi %s1641_s24, %s1855_s24  }
   0x6   : > { %p1663_p1 = scmp.eq.s32.totalorder %s1848_s28, 0  ;;  %p1083_p2 = scmp.ge.s32.totalorder %s1591_s27, 1 }
   0x7   : > { %p205_p3 = scmp.lt.s32.totalorder %s1591_s27, 5  ;;  %s216_s10 = sshll.u32 %s1841_s1, 4  ;;  %s217_s10 = int_to_ptr.hbm [resolvable:$true] %s216_s10 }
   0x8   : > { %p1671_p4 = por %p1663_p1, %p42_p0  ;;  %s1593_s12 = smov [#allocation4]  }
   0x9   : > { %p1678_p5 = pnand %p1083_p2, %p205_p3  ;;  %s218_s13 = sshll.u32 %s1593_s12, 4  ;;  %s219_s13 = int_to_ptr.vmem [resolvable:$true] %s218_s13 }
   0xa   : > { %s242_s17 = sshll.u32 %s1843_s3, 4  ;;  %s1594_s18 = smov 64   ;;  %s243_s17 = int_to_ptr.hbm [resolvable:$true] %s242_s17 }
   0xb   : > { %p1330_p6 = pneg %p1678_p5  ;;  %s1595_s19 = smov 4  }
   0xc   : > { %s1596_s20 = smov [#allocation7]   ;;  %s231_s24 = sshll.u32 %s1842_s2, 4  ;;  %s232_s24 = int_to_ptr.hbm [resolvable:$true] %s231_s24 }
   0xd   : > { %p1686_p7 = pnand %p1330_p6, %p1663_p1  ;;  %s244_s21 = sshll.u32 %s1596_s20, 4  ;;  %s245_s21 = int_to_ptr.vmem [resolvable:$true] %s244_s21 }
   0xe   : > { %s1597_s12 = smov [#allocation6]   ;;  %s1598_s15 = smov [#allocation9]  }
   0xf   : > { %1333 = dma.hbm_to_vmem [thread:$0]  (!%p1686_p7), %s217_s10, 2048, %s219_s13, [#allocation5], %s1594_s18, %s1594_s18, %s1595_s19  }
  0x10   : > { %1339 = dma.hbm_to_vmem [thread:$0]  (!%p1686_p7), %s243_s17, 1024, %s245_s21, [#allocation8], %s1594_s18, %s1594_s18, %s1595_s19  }
  0x11   : > { %s259_s10 = sshll.u32 %s1845_s5, 4  ;;  %s233_s13 = sshll.u32 %s1597_s12, 4  ;;  %s260_s10 = int_to_ptr.hbm [resolvable:$true] %s259_s10  ;;  %s234_s13 = int_to_ptr.vmem [resolvable:$true] %s233_s13 }
  0x12   : > { %1336 = dma.hbm_to_vmem [thread:$0]  (!%p1686_p7), %s232_s24, 16, %s234_s13, [#allocation5]  }
  0x13   : > { %s261_s16 = sshll.u32 %s1598_s15, 4  ;;  %s1708_s17 = sadd.s32 1, %s1591_s27   ;;  %s262_s16 = int_to_ptr.vmem [resolvable:$true] %s261_s16 }
  0x14   : > { %1342 = dma.hbm_to_vmem [thread:$0]  (!%p1686_p7), %s260_s10, 1024, %s262_s16, [#allocation8], %s1594_s18, %s1594_s18, %s1595_s19  }
  0x15   : > { %s29_s20 = sadd.s32 1, %s1587_s26  ;;  %s26_s21 = ssub.s32 %s1591_s27, %s1708_s17 }
  0x16   : > { %p36_p8 = scmp.ne.s32.totalorder %s1587_s26, %s1583_s25  ;;  %p27_p9 = scmp.eq.s32.totalorder %s26_s21, 0 }
  0x17   : > { %p37_p10 = scmp.eq.s32.totalorder %s1591_s27, 0  ;;  %p1351_p11 = scmp.lt.s32.totalorder %s1591_s27, 4 }
  0x18   : > { %s278_s22 = sand.u32 1, %s1587_s26   ;;  %s1232_s8 = sshll.u32 %s1591_s27, 8 }
  0x19   : > { %s1719_s23 = scalar_select %p27_p9, %s1587_s26, %s29_s20  }
  0x1a   : > { %p38_p12 = por %p37_p10, %p36_p8  ;;  %s1089_s24 = sshll.u32 %s278_s22, 8 }
  0x1b   : > { %s288_s14 = scalar_lea.hbm %s1840_s0, %s1232_s8  ;;  %s282_s19 = scalar_lea.vmem [#allocation2], %s1089_s24 }
  0x1c   : > { %s289_s18 = sshll.u32 %s288_s14, 4  ;;  %s291_s10 = sshll.u32 %s282_s19, 4  ;;  %s290_s18 = int_to_ptr.hbm [resolvable:$true] %s289_s18  ;;  %s292_s10 = int_to_ptr.vmem [resolvable:$true] %s291_s10 }
  0x1d   : > { %p1725_p13 = pnand %p1351_p11, %p38_p12  ;;  %s279_s15 = scalar_lea.sflag [#allocation3], %s278_s22 }
  0x1e   : > { %s1519_s16 = sshra.s32 %s290_s18, 4  ;;  %s1526_s24 = scalar_lea.hbm %s1840_s0, 1024  ;;  %s1520_s16 = int_to_ptr.hbm [resolvable:$true] %s1519_s16 }
  0x1f   : > { %s1521_s20 = scalar_lea.hbm %s1520_s16, 256  ;;  %p1523_p2 = pneg %p1725_p13 }
  0x20   : > { %p1522_p0 = scmp.ne.s32.totalorder %s1520_s16, %s1521_s20  ;;  %p1527_p7 = scmp.lt.s32.totalorder %s1520_s16, %s1840_s0 }
  0x21   : > { %p1528_p8 = scmp.lt.s32.totalorder %s1526_s24, %s1521_s20 }
  0x22   : > { %p1524_p3 = pnand %p1523_p2, %p1522_p0 }
  0x23   : > { %p1529_p9 = por %p1528_p8, %p1527_p7 }
  0x24   : > { %p1525_p6 = pneg %p1524_p3 }
  0x26   : > { %p1530_p10 = pnand %p1529_p9, %p1525_p6 }
  0x28   : > { %1533 = shalt.err (!%p1530_p10)
}
  0x29   : > { %s1599_s22 = smov 256   ;;  %s1600_s14 = smov 16  }
  0x2a   : > { %1346 = dma.hbm_to_vmem [thread:$0]  (!%p1725_p13), %s290_s18, 4096, %s292_s10, %s279_s15, %s1599_s22, %s1599_s22, %s1600_s14  }
  0x2b   : > { %303 = sbr.rel (%p1678_p5) target bundleno = 632 (0x278), region = 48  ;;  %s305_s19 = sand.u32 (!%p1678_p5), 1, %s1583_s25  }
  0x2c   : > { %s1094_s21 = sshll.u32 (!%p1678_p5), %s305_s19, 8  ;;  %s306_s8 = scalar_lea.sflag (!%p1678_p5), [#allocation3], %s305_s19 }
  0x2d   : > { %s1742_s28 = scalar_lea.vmem (!%p1678_p5), [#allocation2], %s1094_s21 }
  0x30   : > { %1566 = dma.done.wait (%p1671_p4), %s306_s8, 4096  }
  0x31   : > { %1568 = vsyncadd (%p1671_p4), %s306_s8, 4294963200 }
  0x32   : > { %1570 = dma.done.wait (%p1663_p1), [#allocation5], 2064  }
  0x33   : > { %1572 = vsyncadd (%p1663_p1), [#allocation5], 4294965232 }
  0x34   : > { %1574 = dma.done.wait (%p1663_p1), [#allocation8], 2048  }
  0x35   : > { %1576 = vsyncadd (%p1663_p1), [#allocation8], 4294965248  ;;  %v1240_v0 = vld [vmem:[#allocation4 + $0x38] sm:$0xff]  ;;  %v1239_v2 = vld [vmem:[#allocation4 + $0x30] sm:$0xff]  ;;  %s1854_s30 = sadd.s32 4294967295, %s1591_s27  }
  0x36   : > { %v1248_v1 = vld [vmem:[#allocation4 + $0x78] sm:$0xff]  ;;  %548 = vmatpush.bf16.msra.mxu0 %v1240_v0  ;;  %v1247_v3 = vld [vmem:[#allocation4 + $0x70] sm:$0xff]  ;;  %v1238_v4 = vld [vmem:[#allocation4 + $0x28] sm:$0xff]  ;;  %s1099_s11 = sshll.u32 %s1854_s30, 4 }
  0x37   : > { %597 = vmatpush.bf16.msra.mxu1 %v1248_v1  ;;  %v1246_v5 = vld [vmem:[#allocation4 + $0x68] sm:$0xff]  ;;  %v1237_v6 = vld [vmem:[#allocation4 + $0x20] sm:$0xff]  ;;  %v1236_v8 = vld [vmem:[#allocation4 + $0x18] sm:$0xff]  ;;  %p363_p1 = scmp.lt.s32.totalorder %s1099_s11, 63 }
  0x38   : > { %v1245_v7 = vld [vmem:[#allocation4 + $0x60] sm:$0xff]  ;;  %v1244_v9 = vld [vmem:[#allocation4 + $0x58] sm:$0xff]  ;;  %v1235_v10 = vld [vmem:[#allocation4 + $0x10] sm:$0xff] }
  0x39   : > { %v1243_v11 = vld [vmem:[#allocation4 + $0x50] sm:$0xff]  ;;  %v1234_v12 = vld [vmem:[#allocation4 + $0x8] sm:$0xff]  ;;  %v1233_v14 = vld [vmem:[#allocation4] sm:$0xff]  ;;  %s1860_s11 = smov (!%p363_p1, %s1099_s11), 63 }
  0x3a   : > { %549 = vmatpush.bf16.msra.mxu0 %v1239_v2  ;;  %v1242_v13 = vld [vmem:[#allocation4 + $0x48] sm:$0xff]  ;;  %v1241_v15 = vld [vmem:[#allocation4 + $0x40] sm:$0xff]  ;;  %v370_v17 = vld [vmem:[%s1742_s28 + $0x10] sm:$0xff]  ;;  %s1100_s13 = sshll.u32 %s1860_s11, 2 }
  0x3b   : > { %598 = vmatpush.bf16.msra.mxu1 %v1247_v3  ;;  %v368_v16 = vld [vmem:[%s1742_s28] sm:$0xff]  ;;  %v369_v18 = vld [vmem:[%s1742_s28 + $0x8] sm:$0xff]  ;;  %v371_v19 = vld [vmem:[%s1742_s28 + $0x18] sm:$0xff]  ;;  %s1817_s20 = scalar_lea.vmem %s1847_s7, %s1100_s13 }
  0x3c   : > { %v400_v20 = vpack.c.bf16 %v370_v17, %v368_v16  ;;  %v401_v21 = vpack.c.bf16 %v371_v19, %v369_v18  ;;  %v372_v22 = vld [vmem:[%s1742_s28 + $0x20] sm:$0xff]  ;;  %v374_v23 = vld [vmem:[%s1742_s28 + $0x30] sm:$0xff]  ;;  %v373_v24 = vld [vmem:[%s1742_s28 + $0x28] sm:$0xff] }
  0x3d   : > { %v375_v25 = vld [vmem:[%s1742_s28 + $0x38] sm:$0xff]  ;;  %v402_v26 = vpack.c.bf16 %v374_v23, %v372_v22  ;;  %v376_v28 = vld [vmem:[%s1742_s28 + $0x40] sm:$0xff]  ;;  %v378_v29 = vld [vmem:[%s1742_s28 + $0x50] sm:$0xff] }
  0x3e   : > { %550 = vmatpush.bf16.msra.mxu0 %v1238_v4  ;;  %v403_v27 = vpack.c.bf16 %v375_v25, %v373_v24  ;;  %v377_v30 = vld [vmem:[%s1742_s28 + $0x48] sm:$0xff]  ;;  %v379_v31 = vld [vmem:[%s1742_s28 + $0x58] sm:$0xff]  ;;  %v404_v32 = vpack.c.bf16 %v378_v29, %v376_v28  ;;  %v380_v34 = vld [vmem:[%s1742_s28 + $0x60] sm:$0xff] }
  0x3f   : > { %599 = vmatpush.bf16.msra.mxu1 %v1246_v5  ;;  %v405_v33 = vpack.c.bf16 %v379_v31, %v377_v30  ;;  %v382_v35 = vld [vmem:[%s1742_s28 + $0x70] sm:$0xff]  ;;  %v381_v36 = vld [vmem:[%s1742_s28 + $0x68] sm:$0xff]  ;;  %v383_v37 = vld [vmem:[%s1742_s28 + $0x78] sm:$0xff] }
  0x40   : > { %v406_v38 = vpack.c.bf16 %v382_v35, %v380_v34  ;;  %v407_v39 = vpack.c.bf16 %v383_v37, %v381_v36  ;;  %v384_v40 = vld [vmem:[%s1742_s28 + $0x80] sm:$0xff]  ;;  %v386_v41 = vld [vmem:[%s1742_s28 + $0x90] sm:$0xff]  ;;  %v385_v42 = vld [vmem:[%s1742_s28 + $0x88] sm:$0xff] }
  0x41   : > { %v387_v43 = vld [vmem:[%s1742_s28 + $0x98] sm:$0xff]  ;;  %v408_v44 = vpack.c.bf16 %v386_v41, %v384_v40  ;;  %v388_v47 = vld [vmem:[%s1742_s28 + $0xa0] sm:$0xff]  ;;  %v390_v48 = vld [vmem:[%s1742_s28 + $0xb0] sm:$0xff] }
  0x42   : > { %551 = vmatpush.bf16.msra.mxu0 %v1237_v6  ;;  %v409_v45 = vpack.c.bf16 %v387_v43, %v385_v42  ;;  %v1256_v46 = vld [vmem:[#allocation7 + $0x38] sm:$0xff]  ;;  %v389_v49 = vld [vmem:[%s1742_s28 + $0xa8] sm:$0xff]  ;;  %v410_v51 = vpack.c.bf16 %v390_v48, %v388_v47  ;;  %v1255_v53 = vld [vmem:[#allocation7 + $0x30] sm:$0xff] }
  0x43   : > { %600 = vmatpush.bf16.msra.mxu1 %v1245_v7  ;;  %738 = vmatpush.bf16.msra.mxu2 %v1256_v46  ;;  %v391_v50 = vld [vmem:[%s1742_s28 + $0xb8] sm:$0xff]  ;;  %v1254_v54 = vld [vmem:[#allocation7 + $0x28] sm:$0xff]  ;;  %v1253_v55 = vld [vmem:[#allocation7 + $0x20] sm:$0xff] }
  0x44   : > { %v411_v52 = vpack.c.bf16 %v391_v50, %v389_v49  ;;  %v392_v56 = vld [vmem:[%s1742_s28 + $0xc0] sm:$0xff]  ;;  %v394_v57 = vld [vmem:[%s1742_s28 + $0xd0] sm:$0xff]  ;;  %v393_v58 = vld [vmem:[%s1742_s28 + $0xc8] sm:$0xff] }
  0x45   : > { %v395_v59 = vld [vmem:[%s1742_s28 + $0xd8] sm:$0xff]  ;;  %v412_v60 = vpack.c.bf16 %v394_v57, %v392_v56  ;;  %v1250_v0 = vld [vmem:[#allocation7 + $0x8] sm:$0xff]  ;;  %v396_v1 = vld [vmem:[%s1742_s28 + $0xe0] sm:$0xff] }
  0x46   : > { %552 = vmatpush.bf16.msra.mxu0 %v1236_v8  ;;  %v413_v61 = vpack.c.bf16 %v395_v59, %v393_v58  ;;  %v1252_v62 = vld [vmem:[#allocation7 + $0x18] sm:$0xff]  ;;  %v1251_v63 = vld [vmem:[#allocation7 + $0x10] sm:$0xff]  ;;  %v397_v3 = vld [vmem:[%s1742_s28 + $0xe8] sm:$0xff] }
  0x47   : > { %601 = vmatpush.bf16.msra.mxu1 %v1244_v9  ;;  %739 = vmatpush.bf16.msra.mxu2 %v1255_v53  ;;  %v398_v2 = vld [vmem:[%s1742_s28 + $0xf0] sm:$0xff]  ;;  %v399_v4 = vld [vmem:[%s1742_s28 + $0xf8] sm:$0xff]  ;;  %v1249_v5 = vld [vmem:[#allocation7] sm:$0xff] }
  0x48   : > { %v414_v6 = vpack.c.bf16 %v398_v2, %v396_v1  ;;  %v415_v7 = vpack.c.bf16 %v399_v4, %v397_v3 }
  0x4a   : > { %553 = vmatpush.bf16.msra.mxu0 %v1235_v10  ;;  %v1788_v10 = vld [vmem:[#allocation6] ss:$0 sm:$0xff] }
  0x4b   : > { %602 = vmatpush.bf16.msra.mxu1 %v1243_v11  ;;  %740 = vmatpush.bf16.msra.mxu2 %v1254_v54 }
  0x4e   : > { %554 = vmatpush.bf16.msra.mxu0 %v1234_v12 }
  0x4f   : > { %603 = vmatpush.bf16.msra.mxu1 %v1242_v13  ;;  %741 = vmatpush.bf16.msra.mxu2 %v1253_v55 }
  0x52   : > { %555 = vmatpush.bf16.msra.mxu0 %v1233_v14 }
  0x53   : > { %604 = vmatpush.bf16.msra.mxu1 %v1241_v15  ;;  %742 = vmatpush.bf16.msra.mxu2 %v1252_v62 }
  0x55   : > { %556 = vmatmul.bf16.vlgmr.msra.gmra.mxu0 %v400_v20 }
  0x56   : > { %605 = vmatmul.bf16.vlgmr.msra.gmra.mxu1 %v401_v21 }
  0x57   : > { %743 = vmatpush.bf16.msra.mxu2 %v1251_v63 }
  0x5b   : > { %744 = vmatpush.bf16.msra.mxu2 %v1250_v0 }
  0x5f   : > { %745 = vmatpush.bf16.msra.mxu2 %v1249_v5 }
  0x65   : > { %561 = vmatmul.bf16.gmra.mxu0 %v402_v26 }
  0x66   : > { %610 = vmatmul.bf16.gmra.mxu1 %v403_v27 }
  0x75   : > { %566 = vmatmul.bf16.gmra.mxu0 %v404_v32 }
  0x76   : > { %615 = vmatmul.bf16.gmra.mxu1 %v405_v33 }
  0x85   : > { %571 = vmatmul.bf16.gmra.mxu0 %v406_v38 }
  0x86   : > { %620 = vmatmul.bf16.gmra.mxu1 %v407_v39 }
  0x95   : > { %576 = vmatmul.bf16.gmra.mxu0 %v408_v44 }
  0x96   : > { %625 = vmatmul.bf16.gmra.mxu1 %v409_v45 }
  0xa5   : > { %581 = vmatmul.bf16.gmra.mxu0 %v410_v51 }
  0xa6   : > { %630 = vmatmul.bf16.gmra.mxu1 %v411_v52 }
  0xb5   : > { %586 = vmatmul.bf16.gmra.mxu0 %v412_v60 }
  0xb6   : > { %635 = vmatmul.bf16.gmra.mxu1 %v413_v61 }
  0xc5   : > { %591 = vmatmul.bf16.gmra.mxu0 %v414_v6 }
  0xc6   : > { %640 = vmatmul.bf16.gmra.mxu1 %v415_v7 }
  0xd2   : > { %v557_v8 = vpop.f32.mrf.mxu0 }
  0xd3   : > { %v606_v9 = vpop.f32.mrf.mxu1  ;;  %v558_v11 = vadd.f32 %v1788_v10, %v557_v8 }
  0xd5   : > { %v607_v14 = vadd.f32 %v606_v9, %v558_v11 }
  0xd7   : > { %v646_v17 = vmax.f32 %v607_v14, 0.0  ;;  %v1264_v14 = vld [vmem:[#allocation9 + $0x38] sm:$0xff] }
  0xd8   : > { %879 = vmatpush.bf16.msra.mxu3 %v1264_v14 }
  0xda   : > { %v559_v12 = vpop.f32.mrf.mxu0 }
  0xdb   : > { %v608_v13 = vpop.f32.mrf.mxu1  ;;  %v560_v15 = vadd.f32 %v1788_v10, %v559_v12 }
  0xdd   : > { %v609_v16 = vadd.f32 %v608_v13, %v560_v15  ;;  %v1263_v15 = vld [vmem:[#allocation9 + $0x30] sm:$0xff] }
  0xde   : > { %880 = vmatpush.bf16.msra.mxu3 %v1263_v15 }
  0xdf   : > { %v647_v18 = vmax.f32 %v609_v16, 0.0 }
  0xe1   : > { %v662_v19 = vpack.c.bf16 %v647_v18, %v646_v17  ;;  %v1262_v17 = vld [vmem:[#allocation9 + $0x28] sm:$0xff] }
  0xe2   : > { %v562_v20 = vpop.f32.mrf.mxu0  ;;  %881 = vmatpush.bf16.msra.mxu3 %v1262_v17 }
  0xe3   : > { %v611_v21 = vpop.f32.mrf.mxu1  ;;  %746 = vmatmul.bf16.vlgmr.msra.gmra.mxu2 %v662_v19  ;;  %v563_v22 = vadd.f32 %v1788_v10, %v562_v20 }
  0xe5   : > { %v612_v25 = vadd.f32 %v611_v21, %v563_v22 }
  0xe7   : > { %v648_v28 = vmax.f32 %v612_v25, 0.0 }
  0xea   : > { %v564_v23 = vpop.f32.mrf.mxu0 }
  0xeb   : > { %v613_v24 = vpop.f32.mrf.mxu1  ;;  %v565_v26 = vadd.f32 %v1788_v10, %v564_v23  ;;  %v1261_v23 = vld [vmem:[#allocation9 + $0x20] sm:$0xff] }
  0xec   : > { %882 = vmatpush.bf16.msra.mxu3 %v1261_v23 }
  0xed   : > { %v614_v27 = vadd.f32 %v613_v24, %v565_v26 }
  0xef   : > { %v649_v29 = vmax.f32 %v614_v27, 0.0 }
  0xf1   : > { %v663_v30 = vpack.c.bf16 %v649_v29, %v648_v28  ;;  %v1260_v29 = vld [vmem:[#allocation9 + $0x18] sm:$0xff] }
  0xf2   : > { %v567_v31 = vpop.f32.mrf.mxu0  ;;  %883 = vmatpush.bf16.msra.mxu3 %v1260_v29 }
  0xf3   : > { %v616_v32 = vpop.f32.mrf.mxu1  ;;  %751 = vmatmul.bf16.gmra.mxu2 %v663_v30  ;;  %v568_v33 = vadd.f32 %v1788_v10, %v567_v31  ;;  %v1259_v31 = vld [vmem:[#allocation9 + $0x10] sm:$0xff] }
  0xf5   : > { %v617_v36 = vadd.f32 %v616_v32, %v568_v33 }
  0xf6   : > { %884 = vmatpush.bf16.msra.mxu3 %v1259_v31 }
  0xf7   : > { %v650_v39 = vmax.f32 %v617_v36, 0.0  ;;  %v1258_v36 = vld [vmem:[#allocation9 + $0x8] sm:$0xff] }
  0xfa   : > { %v569_v34 = vpop.f32.mrf.mxu0  ;;  %885 = vmatpush.bf16.msra.mxu3 %v1258_v36  ;;  %v1398_v36 = vld [vmem:[%s1846_s6] ss:$0 sm:$0xff] }
  0xfb   : > { %v618_v35 = vpop.f32.mrf.mxu1  ;;  %v570_v37 = vadd.f32 %v1788_v10, %v569_v34 }
  0xfd   : > { %v619_v38 = vadd.f32 %v618_v35, %v570_v37 }
  0xff   : > { %v651_v40 = vmax.f32 %v619_v38, 0.0 }
 0x101   : > { %v664_v41 = vpack.c.bf16 %v651_v40, %v650_v39  ;;  %v1257_v40 = vld [vmem:[#allocation9] sm:$0xff] }
 0x102   : > { %v572_v42 = vpop.f32.mrf.mxu0  ;;  %886 = vmatpush.bf16.msra.mxu3 %v1257_v40 }
 0x103   : > { %v621_v43 = vpop.f32.mrf.mxu1  ;;  %756 = vmatmul.bf16.gmra.mxu2 %v664_v41  ;;  %v573_v44 = vadd.f32 %v1788_v10, %v572_v42 }
 0x105   : > { %v622_v47 = vadd.f32 %v621_v43, %v573_v44  ;;  %v1397_v43 = vld [vmem:[%s1844_s4] ss:$0 sm:$0xff] }
 0x107   : > { %v652_v50 = vmax.f32 %v622_v47, 0.0 }
 0x10a   : > { %v574_v45 = vpop.f32.mrf.mxu0 }
 0x10b   : > { %v623_v46 = vpop.f32.mrf.mxu1  ;;  %v575_v48 = vadd.f32 %v1788_v10, %v574_v45 }
 0x10d   : > { %v624_v49 = vadd.f32 %v623_v46, %v575_v48 }
 0x10f   : > { %v653_v51 = vmax.f32 %v624_v49, 0.0 }
 0x111   : > { %v665_v52 = vpack.c.bf16 %v653_v51, %v652_v50 }
 0x112   : > { %v577_v53 = vpop.f32.mrf.mxu0 }
 0x113   : > { %v626_v54 = vpop.f32.mrf.mxu1  ;;  %761 = vmatmul.bf16.gmra.mxu2 %v665_v52  ;;  %v578_v55 = vadd.f32 %v1788_v10, %v577_v53 }
 0x115   : > { %v627_v58 = vadd.f32 %v626_v54, %v578_v55 }
 0x117   : > { %v654_v61 = vmax.f32 %v627_v58, 0.0 }
 0x11a   : > { %v579_v56 = vpop.f32.mrf.mxu0 }
 0x11b   : > { %v628_v57 = vpop.f32.mrf.mxu1  ;;  %v580_v59 = vadd.f32 %v1788_v10, %v579_v56 }
 0x11d   : > { %v629_v60 = vadd.f32 %v628_v57, %v580_v59 }
 0x11f   : > { %v655_v62 = vmax.f32 %v629_v60, 0.0 }
 0x121   : > { %v666_v63 = vpack.c.bf16 %v655_v62, %v654_v61 }
 0x122   : > { %v582_v0 = vpop.f32.mrf.mxu0 }
 0x123   : > { %v631_v1 = vpop.f32.mrf.mxu1  ;;  %766 = vmatmul.bf16.gmra.mxu2 %v666_v63  ;;  %v583_v2 = vadd.f32 %v1788_v10, %v582_v0 }
 0x125   : > { %v632_v5 = vadd.f32 %v631_v1, %v583_v2 }
 0x127   : > { %v656_v8 = vmax.f32 %v632_v5, 0.0 }
 0x12a   : > { %v584_v3 = vpop.f32.mrf.mxu0 }
 0x12b   : > { %v633_v4 = vpop.f32.mrf.mxu1  ;;  %v585_v6 = vadd.f32 %v1788_v10, %v584_v3 }
 0x12d   : > { %v634_v7 = vadd.f32 %v633_v4, %v585_v6 }
 0x12f   : > { %v657_v9 = vmax.f32 %v634_v7, 0.0 }
 0x131   : > { %v667_v11 = vpack.c.bf16 %v657_v9, %v656_v8 }
 0x132   : > { %v587_v12 = vpop.f32.mrf.mxu0 }
 0x133   : > { %v636_v13 = vpop.f32.mrf.mxu1  ;;  %771 = vmatmul.bf16.gmra.mxu2 %v667_v11  ;;  %v588_v16 = vadd.f32 %v1788_v10, %v587_v12 }
 0x135   : > { %v637_v20 = vadd.f32 %v636_v13, %v588_v16 }
 0x137   : > { %v658_v24 = vmax.f32 %v637_v20, 0.0 }
 0x13a   : > { %v589_v18 = vpop.f32.mrf.mxu0 }
 0x13b   : > { %v638_v19 = vpop.f32.mrf.mxu1  ;;  %v590_v21 = vadd.f32 %v1788_v10, %v589_v18 }
 0x13d   : > { %v639_v22 = vadd.f32 %v638_v19, %v590_v21 }
 0x13f   : > { %v659_v25 = vmax.f32 %v639_v22, 0.0 }
 0x141   : > { %v668_v26 = vpack.c.bf16 %v659_v25, %v658_v24 }
 0x142   : > { %v592_v27 = vpop.f32.mrf.mxu0 }
 0x143   : > { %v641_v28 = vpop.f32.mrf.mxu1  ;;  %776 = vmatmul.bf16.gmra.mxu2 %v668_v26  ;;  %v593_v30 = vadd.f32 %v1788_v10, %v592_v27 }
 0x145   : > { %v642_v33 = vadd.f32 %v641_v28, %v593_v30 }
 0x147   : > { %v660_v38 = vmax.f32 %v642_v33, 0.0 }
 0x14a   : > { %v594_v32 = vpop.f32.mrf.mxu0 }
 0x14b   : > { %v595_v34 = vadd.f32 %v1788_v10, %v594_v32  ;;  %v643_v35 = vpop.f32.mrf.mxu1 }
 0x14d   : > { %v644_v37 = vadd.f32 %v643_v35, %v595_v34 }
 0x14f   : > { %v661_v39 = vmax.f32 %v644_v37, 0.0 }
 0x151   : > { %v669_v41 = vpack.c.bf16 %v661_v39, %v660_v38 }
 0x153   : > { %781 = vmatmul.bf16.gmra.mxu2 %v669_v41 }
 0x166   : > { %v747_v42 = vpop.f32.mrf.mxu2 }
 0x167   : > { %v748_v44 = vadd.f32 %v1397_v43, %v747_v42 }
 0x169   : > { %v787_v47 = vmax.f32 %v748_v44, 0.0 }
 0x16e   : > { %v749_v45 = vpop.f32.mrf.mxu2 }
 0x16f   : > { %v750_v46 = vadd.f32 %v1397_v43, %v749_v45 }
 0x171   : > { %v788_v10 = vmax.f32 %v750_v46, 0.0 }
 0x173   : > { %v803_v48 = vpack.c.bf16 %v788_v10, %v787_v47 }
 0x175   : > { %887 = vmatmul.bf16.vlgmr.msra.gmra.mxu3 %v803_v48 }
 0x176   : > { %v752_v49 = vpop.f32.mrf.mxu2 }
 0x177   : > { %v753_v50 = vadd.f32 %v1397_v43, %v752_v49 }
 0x179   : > { %v789_v53 = vmax.f32 %v753_v50, 0.0 }
 0x17e   : > { %v754_v51 = vpop.f32.mrf.mxu2 }
 0x17f   : > { %v755_v52 = vadd.f32 %v1397_v43, %v754_v51 }
 0x181   : > { %v790_v54 = vmax.f32 %v755_v52, 0.0 }
 0x183   : > { %v804_v55 = vpack.c.bf16 %v790_v54, %v789_v53 }
 0x185   : > { %892 = vmatmul.bf16.gmra.mxu3 %v804_v55 }
 0x186   : > { %v757_v56 = vpop.f32.mrf.mxu2 }
 0x187   : > { %v758_v57 = vadd.f32 %v1397_v43, %v757_v56 }
 0x189   : > { %v791_v60 = vmax.f32 %v758_v57, 0.0 }
 0x18e   : > { %v759_v58 = vpop.f32.mrf.mxu2 }
 0x18f   : > { %v760_v59 = vadd.f32 %v1397_v43, %v759_v58 }
 0x191   : > { %v792_v61 = vmax.f32 %v760_v59, 0.0 }
 0x193   : > { %v805_v62 = vpack.c.bf16 %v792_v61, %v791_v60 }
 0x195   : > { %897 = vmatmul.bf16.gmra.mxu3 %v805_v62 }
 0x196   : > { %v762_v63 = vpop.f32.mrf.mxu2 }
 0x197   : > { %v763_v0 = vadd.f32 %v1397_v43, %v762_v63 }
 0x199   : > { %v793_v3 = vmax.f32 %v763_v0, 0.0 }
 0x19e   : > { %v764_v1 = vpop.f32.mrf.mxu2 }
 0x19f   : > { %v765_v2 = vadd.f32 %v1397_v43, %v764_v1 }
 0x1a1   : > { %v794_v4 = vmax.f32 %v765_v2, 0.0 }
 0x1a3   : > { %v806_v5 = vpack.c.bf16 %v794_v4, %v793_v3 }
 0x1a5   : > { %902 = vmatmul.bf16.gmra.mxu3 %v806_v5 }
 0x1a6   : > { %v767_v6 = vpop.f32.mrf.mxu2 }
 0x1a7   : > { %v768_v7 = vadd.f32 %v1397_v43, %v767_v6 }
 0x1a9   : > { %v795_v11 = vmax.f32 %v768_v7, 0.0 }
 0x1ae   : > { %v769_v8 = vpop.f32.mrf.mxu2 }
 0x1af   : > { %v770_v9 = vadd.f32 %v1397_v43, %v769_v8 }
 0x1b1   : > { %v796_v12 = vmax.f32 %v770_v9, 0.0 }
 0x1b3   : > { %v807_v13 = vpack.c.bf16 %v796_v12, %v795_v11 }
 0x1b5   : > { %907 = vmatmul.bf16.gmra.mxu3 %v807_v13 }
 0x1b6   : > { %v772_v14 = vpop.f32.mrf.mxu2 }
 0x1b7   : > { %v773_v15 = vadd.f32 %v1397_v43, %v772_v14 }
 0x1b9   : > { %v797_v18 = vmax.f32 %v773_v15, 0.0 }
 0x1be   : > { %v774_v16 = vpop.f32.mrf.mxu2 }
 0x1bf   : > { %v775_v17 = vadd.f32 %v1397_v43, %v774_v16 }
 0x1c1   : > { %v798_v19 = vmax.f32 %v775_v17, 0.0 }
 0x1c3   : > { %v808_v20 = vpack.c.bf16 %v798_v19, %v797_v18 }
 0x1c5   : > { %912 = vmatmul.bf16.gmra.mxu3 %v808_v20 }
 0x1c6   : > { %v777_v21 = vpop.f32.mrf.mxu2 }
 0x1c7   : > { %v778_v22 = vadd.f32 %v1397_v43, %v777_v21 }
 0x1c9   : > { %v799_v25 = vmax.f32 %v778_v22, 0.0 }
 0x1ce   : > { %v779_v23 = vpop.f32.mrf.mxu2 }
 0x1cf   : > { %v780_v24 = vadd.f32 %v1397_v43, %v779_v23 }
 0x1d1   : > { %v800_v26 = vmax.f32 %v780_v24, 0.0 }
 0x1d3   : > { %v809_v27 = vpack.c.bf16 %v800_v26, %v799_v25 }
 0x1d5   : > { %917 = vmatmul.bf16.gmra.mxu3 %v809_v27 }
 0x1d6   : > { %v782_v28 = vpop.f32.mrf.mxu2 }
 0x1d7   : > { %v783_v29 = vadd.f32 %v1397_v43, %v782_v28 }
 0x1d9   : > { %v801_v32 = vmax.f32 %v783_v29, 0.0 }
 0x1de   : > { %v784_v30 = vpop.f32.mrf.mxu2 }
 0x1df   : > { %v785_v31 = vadd.f32 %v1397_v43, %v784_v30 }
 0x1e1   : > { %v802_v33 = vmax.f32 %v785_v31, 0.0 }
 0x1e3   : > { %v810_v34 = vpack.c.bf16 %v802_v33, %v801_v32 }
 0x1e5   : > { %922 = vmatmul.bf16.gmra.mxu3 %v810_v34 }
 0x1f8   : > { %v888_v35 = vpop.f32.mrf.mxu3 }
 0x1f9   : > { %v889_v37 = vadd.f32 %v1398_v36, %v888_v35 }
 0x1fb   : > { %v928_v40 = vmax.f32 %v889_v37, 0.0 }
 0x200   : > { %v890_v38 = vpop.f32.mrf.mxu3 }
 0x201   : > { %v891_v39 = vadd.f32 %v1398_v36, %v890_v38 }
 0x203   : > { %v929_v41 = vmax.f32 %v891_v39, 0.0 }
 0x205   : > { %v1268_v42 = vpack.c.bf16 %v929_v41, %v928_v40 }
 0x207   : > { %1269 = vst [vmem:[%s1817_s20] sm:$0xff] %v1268_v42  }
 0x208   : > { %v893_v43 = vpop.f32.mrf.mxu3 }
 0x209   : > { %v894_v44 = vadd.f32 %v1398_v36, %v893_v43 }
 0x20b   : > { %v930_v47 = vmax.f32 %v894_v44, 0.0 }
 0x210   : > { %v895_v45 = vpop.f32.mrf.mxu3 }
 0x211   : > { %v896_v46 = vadd.f32 %v1398_v36, %v895_v45 }
 0x213   : > { %v931_v10 = vmax.f32 %v896_v46, 0.0 }
 0x215   : > { %v1273_v48 = vpack.c.bf16 %v931_v10, %v930_v47 }
 0x217   : > { %1305 = vst [vmem:[%s1817_s20 + $0x8] sm:$0xff] %v1273_v48  }
 0x218   : > { %v898_v49 = vpop.f32.mrf.mxu3 }
 0x219   : > { %v899_v50 = vadd.f32 %v1398_v36, %v898_v49 }
 0x21b   : > { %v932_v53 = vmax.f32 %v899_v50, 0.0 }
 0x220   : > { %v900_v51 = vpop.f32.mrf.mxu3 }
 0x221   : > { %v901_v52 = vadd.f32 %v1398_v36, %v900_v51 }
 0x223   : > { %v933_v54 = vmax.f32 %v901_v52, 0.0 }
 0x225   : > { %v1278_v55 = vpack.c.bf16 %v933_v54, %v932_v53 }
 0x227   : > { %1306 = vst [vmem:[%s1817_s20 + $0x10] sm:$0xff] %v1278_v55  }
 0x228   : > { %v903_v56 = vpop.f32.mrf.mxu3 }
 0x229   : > { %v904_v57 = vadd.f32 %v1398_v36, %v903_v56 }
 0x22b   : > { %v934_v60 = vmax.f32 %v904_v57, 0.0 }
 0x230   : > { %v905_v58 = vpop.f32.mrf.mxu3 }
 0x231   : > { %v906_v59 = vadd.f32 %v1398_v36, %v905_v58 }
 0x233   : > { %v935_v61 = vmax.f32 %v906_v59, 0.0 }
 0x235   : > { %v1283_v62 = vpack.c.bf16 %v935_v61, %v934_v60 }
 0x237   : > { %1307 = vst [vmem:[%s1817_s20 + $0x18] sm:$0xff] %v1283_v62  }
 0x238   : > { %v908_v63 = vpop.f32.mrf.mxu3 }
 0x239   : > { %v909_v0 = vadd.f32 %v1398_v36, %v908_v63 }
 0x23b   : > { %v936_v3 = vmax.f32 %v909_v0, 0.0 }
 0x240   : > { %v910_v1 = vpop.f32.mrf.mxu3 }
 0x241   : > { %v911_v2 = vadd.f32 %v1398_v36, %v910_v1 }
 0x243   : > { %v937_v4 = vmax.f32 %v911_v2, 0.0 }
 0x245   : > { %v1288_v5 = vpack.c.bf16 %v937_v4, %v936_v3 }
 0x247   : > { %1308 = vst [vmem:[%s1817_s20 + $0x20] sm:$0xff] %v1288_v5  }
 0x248   : > { %v913_v6 = vpop.f32.mrf.mxu3 }
 0x249   : > { %v914_v7 = vadd.f32 %v1398_v36, %v913_v6 }
 0x24b   : > { %v938_v11 = vmax.f32 %v914_v7, 0.0 }
 0x250   : > { %v915_v8 = vpop.f32.mrf.mxu3 }
 0x251   : > { %v916_v9 = vadd.f32 %v1398_v36, %v915_v8 }
 0x253   : > { %v939_v12 = vmax.f32 %v916_v9, 0.0 }
 0x255   : > { %v1293_v13 = vpack.c.bf16 %v939_v12, %v938_v11 }
 0x257   : > { %1309 = vst [vmem:[%s1817_s20 + $0x28] sm:$0xff] %v1293_v13  }
 0x258   : > { %v918_v14 = vpop.f32.mrf.mxu3 }
 0x259   : > { %v919_v15 = vadd.f32 %v1398_v36, %v918_v14 }
 0x25b   : > { %v940_v18 = vmax.f32 %v919_v15, 0.0 }
 0x260   : > { %v920_v16 = vpop.f32.mrf.mxu3 }
 0x261   : > { %v921_v17 = vadd.f32 %v1398_v36, %v920_v16 }
 0x263   : > { %v941_v19 = vmax.f32 %v921_v17, 0.0 }
 0x265   : > { %v1298_v20 = vpack.c.bf16 %v941_v19, %v940_v18 }
 0x267   : > { %1310 = vst [vmem:[%s1817_s20 + $0x30] sm:$0xff] %v1298_v20  }
 0x268   : > { %v923_v21 = vpop.f32.mrf.mxu3 }
 0x269   : > { %v924_v22 = vadd.f32 %v1398_v36, %v923_v21 }
 0x26b   : > { %v942_v25 = vmax.f32 %v924_v22, 0.0 }
 0x270   : > { %v925_v23 = vpop.f32.mrf.mxu3 }
 0x271   : > { %v926_v24 = vadd.f32 %v1398_v36, %v925_v23 }
 0x273   : > { %v943_v26 = vmax.f32 %v926_v24, 0.0 }
 0x275   : > { %v1303_v27 = vpack.c.bf16 %v943_v26, %v942_v25 }
 0x277   : > { %1311 = vst [vmem:[%s1817_s20 + $0x38] sm:$0xff] %v1303_v27  }
 0x278 PF: > { %p19_p4 = scmp.ge.s32.totalorder %s1708_s17, 6   ;;  %s1855_s24 = smov %s1583_s25 }
 0x279   : > { %s1856_s25 = smov %s1587_s26  ;;  %s1857_s26 = smov %s1719_s23 }
 0x27a   : > { %s1858_s27 = smov %s1708_s17  ;;  %21 = sbr.rel (!%p19_p4) target bundleno = 5 (0x5), region = 104 }
 0x27f   :  { %998 = vsyncpa [#allocation3], 1 }
 0x280   :  { %1000 = vsyncpa [#allocation3 + $0x1], 1 }
 0x281   :  { %1001 = vsyncpa [#allocation5], 1 }
 0x282   :  { %1002 = vsyncpa [#allocation8], 1 }

</bundles_post_ra>
